<compile_context>
chip_gen: v7x
topology: tpu7x:2x2x1
jax: 0.10.0
libtpu: 0.0.40
codegen_flags: <defaults>
</compile_context>

<pallas_src>
import jax
import jax.numpy as jnp
from jax.experimental import pallas as pl
from jax.experimental.pallas import tpu as pltpu


# ----------------------------- Pallas kernel ------------------------------ #
def _conv_bias_relu_kernel(p_ref, w_ref, b_ref, o_ref):
    # p_ref: (1, K, T)     bf16 im2col patches for one (batch, spatial-tile)
    # w_ref: (Cout, K)     bf16 flattened conv weights (resident across grid)
    # b_ref: (Cout, 1)     f32 bias (resident across grid)
    # o_ref: (1, Cout, T)  f32 output tile, Cout-major == NCHW-flat
    acc = jnp.dot(w_ref[...], p_ref[0], preferred_element_type=jnp.float32)
    acc = acc + b_ref[...]                      # broadcast bias over lanes
    o_ref[0] = jnp.maximum(acc, 0.0).astype(o_ref.dtype)


def _pick_spatial_tile(hw: int) -> int:
    """Largest divisor of hw that is a multiple of 128 (capped at 2048)."""
    best = 0
    t = 128
    while t <= min(hw, 2048):
        if hw % t == 0:
            best = t
        t += 128
    return best if best > 0 else hw   # tiny / odd spatial: one full-HW tile


def _conv_relu_pallas(patches, w_flat, bias2d, tile):
    N, K, HW = patches.shape
    Cout = w_flat.shape[0]
    grid = (N, HW // tile)
    return pl.pallas_call(
        _conv_bias_relu_kernel,
        out_shape=jax.ShapeDtypeStruct((N, Cout, HW), jnp.float32),
        grid_spec=pltpu.PrefetchScalarGridSpec(
            num_scalar_prefetch=0,
            grid=grid,
            in_specs=[
                pl.BlockSpec((1, K, tile), lambda n, t: (n, 0, t)),
                pl.BlockSpec((Cout, K), lambda n, t: (0, 0)),
                pl.BlockSpec((Cout, 1), lambda n, t: (0, 0)),
            ],
            out_specs=pl.BlockSpec((1, Cout, tile), lambda n, t: (n, 0, t)),
        ),
        compiler_params=pltpu.CompilerParams(
            dimension_semantics=("parallel", "parallel")),
    )(patches, w_flat, bias2d)


# ------------------------------- JAX glue --------------------------------- #
def _im2col_3x3_pad1_kmajor(x_nchw):
    """(N, C, H, W) -> (N, 9*C, H*W); row index = (kh*3+kw)*C + c."""
    N, C, H, W = x_nchw.shape
    xp = jnp.pad(x_nchw, ((0, 0), (0, 0), (1, 1), (1, 1)))
    taps = [xp[:, :, kh:kh + H, kw:kw + W]          # each (N, C, H, W)
            for kh in range(3) for kw in range(3)]
    patches = jnp.stack(taps, axis=1)               # (N, 9, C, H, W)
    return patches.reshape(N, 9 * C, H * W)


# TODO(synk): fuse im2col into the kernel (row-tiled halo via
# memory_space=pl.ANY + manual pltpu.make_async_copy) to remove the 9x patch
# inflation in HBM entirely.
@jax.jit
def modified_vgg_plot_forward(x_nchw, w_oihw, bias):
    """Forward pass of Modified_VGG_plot: ReLU(Conv2d(3->64, 3x3, pad=1))."""
    N, Cin, H, W = x_nchw.shape
    Cout = w_oihw.shape[0]

    patches = _im2col_3x3_pad1_kmajor(x_nchw).astype(jnp.bfloat16)
    # (Cout, Cin, KH, KW) -> (Cout, KH, KW, Cin) -> (Cout, 9*Cin); matches the
    # tap-major / channel-minor row ordering of the patches.
    w_flat = jnp.transpose(w_oihw, (0, 2, 3, 1)).reshape(Cout, 9 * Cin)
    w_flat = w_flat.astype(jnp.bfloat16)
    b2 = bias.reshape(Cout, 1).astype(jnp.float32)

    tile = _pick_spatial_tile(H * W)
    out = _conv_relu_pallas(patches, w_flat, b2, tile)   # (N, Cout, H*W) f32
    return out.reshape(N, Cout, H, W)                    # already NCHW


# ------------------------------ reference --------------------------------- #
def _reference_forward(x_nchw, w_oihw, bias):
    y = jax.lax.conv_general_dilated(
        x_nchw, w_oihw, window_strides=(1, 1), padding="SAME",
        dimension_numbers=("NCHW", "OIHW", "NCHW"))
    y = y + bias.reshape(1, -1, 1, 1)
    return jnp.maximum(y, 0.0)


if __name__ == "__main__":
    key = jax.random.PRNGKey(0)
    kx, kw, kb = jax.random.split(key, 3)

    N, Cin, H, W, Cout = 2, 3, 16, 16, 64

    # Deterministic synthetic parameters (vgg16.features[0] shapes).
    x = jax.random.normal(kx, (N, Cin, H, W), dtype=jnp.float32)
    w = 0.1 * jax.random.normal(kw, (Cout, Cin, 3, 3), dtype=jnp.float32)
    b = 0.1 * jax.random.normal(kb, (Cout,), dtype=jnp.float32)

    out = modified_vgg_plot_forward(x, w, b)
    out = jax.block_until_ready(out)
    assert out.shape == (N, Cout, H, W)

    # Reference on bf16-rounded inputs (same quantization as the kernel's MXU
    # inputs, f32 accumulation in both) -> tight tolerance catches layout bugs.
    xq = x.astype(jnp.bfloat16).astype(jnp.float32)
    wq = w.astype(jnp.bfloat16).astype(jnp.float32)
    ref = _reference_forward(xq, wq, b)
    err = float(jnp.max(jnp.abs(out - ref)))
    assert err < 1e-3, f"mismatch vs bf16-quantized reference: {err}"

    # Sanity vs the exact f32 module semantics (bf16 inputs => loose bound).
    ref_f32 = _reference_forward(x, w, b)
    err_f32 = float(jnp.max(jnp.abs(out - ref_f32)))
    assert err_f32 < 5e-2, f"mismatch vs f32 reference conv: {err_f32}"

    print("KERNEL_OK")
</pallas_src>

<mosaic_0001>
module attributes {stable_mosaic.version = 11 : i64} {
  func.func @_conv_bias_relu_kernel(%arg0: i32, %arg1: i32, %arg2: memref<1x27x256xbf16, #tpu.memory_space<vmem>>, %arg3: memref<64x27xbf16, #tpu.memory_space<vmem>>, %arg4: memref<64x1xf32, #tpu.memory_space<vmem>>, %arg5: memref<1x64x256xf32, #tpu.memory_space<vmem>>) attributes {dimension_semantics = [#tpu.dimension_semantics<parallel>, #tpu.dimension_semantics<parallel>], iteration_bounds = array<i64: 2, 1>, scalar_prefetch = 0 : i64, scratch_operands = 0 : i64, tpu.core_type = #tpu.core_type<tc>, window_params = [{transform_indices = @transform_0, window_bounds = array<i64: 1, 27, 256>}, {pipeline_mode = #tpu.pipeline_mode<synchronous>, transform_indices = @transform_1, window_bounds = array<i64: 64, 27>}, {pipeline_mode = #tpu.pipeline_mode<synchronous>, transform_indices = @transform_2, window_bounds = array<i64: 64, 1>}, {transform_indices = @transform_3, window_bounds = array<i64: 1, 64, 256>}]} {
    %c0 = arith.constant 0 : index
    %c0_0 = arith.constant 0 : index
    %0 = vector.load %arg3[%c0, %c0_0] : memref<64x27xbf16, #tpu.memory_space<vmem>>, vector<64x27xbf16>
    %c0_1 = arith.constant 0 : index
    %c0_2 = arith.constant 0 : index
    %c0_3 = arith.constant 0 : index
    %1 = vector.load %arg2[%c0_1, %c0_2, %c0_3] : memref<1x27x256xbf16, #tpu.memory_space<vmem>>, vector<1x27x256xbf16>
    %2 = vector.shape_cast %1 : vector<1x27x256xbf16> to vector<27x256xbf16>
    %cst = arith.constant dense<0.000000e+00> : vector<64x256xf32>
    %3 = tpu.matmul %0, %2, %cst {dimension_numbers = #tpu.dot_dimension_numbers<[1], [0], [0], [1], [0, 0, 1, 1], [], []>} : vector<64x27xbf16>, vector<27x256xbf16>, vector<64x256xf32> -> vector<64x256xf32>
    %c0_4 = arith.constant 0 : index
    %c0_5 = arith.constant 0 : index
    %4 = vector.load %arg4[%c0_4, %c0_5] : memref<64x1xf32, #tpu.memory_space<vmem>>, vector<64x1xf32>
    %5 = vector.broadcast %4 : vector<64x1xf32> to vector<64x256xf32>
    %6 = arith.addf %3, %5 : vector<64x256xf32>
    %cst_6 = arith.constant 0.000000e+00 : f32
    %7 = vector.broadcast %cst_6 : f32 to vector<64x256xf32>
    %8 = arith.maximumf %6, %7 : vector<64x256xf32>
    %c0_7 = arith.constant 0 : index
    %c0_8 = arith.constant 0 : index
    %c0_9 = arith.constant 0 : index
    %9 = vector.load %arg5[%c0_7, %c0_8, %c0_9] : memref<1x64x256xf32, #tpu.memory_space<vmem>>, vector<1x64x256xf32>
    %10 = vector.shape_cast %9 : vector<1x64x256xf32> to vector<64x256xf32>
    %11 = vector.shape_cast %8 : vector<64x256xf32> to vector<1x64x256xf32>
    tpu.vector_store %arg5[%c0_7, %c0_8, %c0_9], %11 {strides = array<i32>} : memref<1x64x256xf32, #tpu.memory_space<vmem>>, vector<1x64x256xf32>,
    return
  }
  func.func @transform_0(%arg0: i32, %arg1: i32) -> (i32, i32, i32) {
    %c0_i32 = arith.constant 0 : i32
    %c0_i32_0 = arith.constant 0 : i32
    return %arg0, %c0_i32, %arg1 : i32, i32, i32
  }
  func.func @transform_1(%arg0: i32, %arg1: i32) -> (i32, i32) {
    %c0_i32 = arith.constant 0 : i32
    %c0_i32_0 = arith.constant 0 : i32
    %c0_i32_1 = arith.constant 0 : i32
    return %c0_i32, %c0_i32_0 : i32, i32
  }
  func.func @transform_2(%arg0: i32, %arg1: i32) -> (i32, i32) {
    %c0_i32 = arith.constant 0 : i32
    %c0_i32_0 = arith.constant 0 : i32
    %c0_i32_1 = arith.constant 0 : i32
    return %c0_i32, %c0_i32_0 : i32, i32
  }
  func.func @transform_3(%arg0: i32, %arg1: i32) -> (i32, i32, i32) {
    %c0_i32 = arith.constant 0 : i32
    %c0_i32_0 = arith.constant 0 : i32
    return %arg0, %c0_i32, %arg1 : i32, i32, i32
  }
}

</mosaic_0001>

<bundles_post_ra>
// kernel: modified_vgg_plot_forward.1
= control target key start
LH: loop header
LB: loop body
LE: loop exit
PB: predicated region body
PF: predicated region fallthrough
CT: control target
= control target key end

     0   :  { %s637_s12 = smov 0   ;;  %s639_s13 = smov 0   ;;  %s728_s0 = inlined_call_operand.vmem [shape: bf16[2,27,256], index: 0, kind: input, shape index: {}]   ;;  %s729_s1 = inlined_call_operand.vmem [shape: bf16[64,27], index: 1, kind: input, shape index: {}]   ;;  %s730_s2 = inlined_call_operand.vmem [shape: f32[64,1], index: 2, kind: input, shape index: {}]   ;;  %s731_s3 = inlined_call_operand.vmem [shape: f32[2,64,256], index: 3, kind: output, shape index: {}]  }
   0x1   :  { %s641_s14 = smov 0  }
   0x2 LB: > { %s25_s15 = sadd.s32 1, %s609_s13  ;;  %p528_p0 = scmp.ge.s32.totalorder %s613_s14, 1  ;;  %s613_s14 = sphi %s641_s14, %s13_s14   ;;  %s609_s13 = sphi %s639_s13, %s733_s13   ;;  %s605_s12 = sphi %s637_s12, %s732_s12  }
   0x3   : > { %p27_p1 = scmp.ge.s32.totalorder %s25_s15, 2  ;;  %p158_p2 = scmp.lt.s32.totalorder %s613_s14, 3 }
   0x5   : > { %s735_s15 = smov (%p27_p1, %s25_s15), 0  ;;  %p159_p3 = pnand %p528_p0, %p158_p2 }
   0x6   : > { %p191_p4 = scmp.lt.s32.totalorder (!%p159_p3), %s605_s12, 1  ;;  %vm322_vm0 = vcmask (!%p159_p3), 1044480   ;;  %v615_v0 = vmov (!%p159_p3), 0   ;;  %vm323_vm1 = vcmask (!%p159_p3), 1045504   ;;  %v616_v1 = vmov (!%p159_p3), 65535   ;;  %v225_v3 = vld [vmem:[%s730_s2 + $0x10] sm:$0xff] (!%p159_p3) }
   0x7   : > { %162 = sbr.rel (%p159_p3) target bundleno = 254 (0xfe), region = 32  ;;  %364 = vmatprep.mubr.bf16.mxu0 (!%p159_p3), %v615_v0  ;;  %384 = vmatprep.mubr.bf16.mxu1 (!%p159_p3), %v615_v0  ;;  %v324_v2 = vsel (!%p159_p3), %vm322_vm0, 4294967295, %v616_v1  ;;  %v223_v4 = vld [vmem:[%s730_s2] sm:$0xff] (!%p159_p3)  ;;  %v226_v10 = vld [vmem:[%s730_s2 + $0x18] sm:$0xff] (!%p159_p3)  ;;  %v224_v11 = vld [vmem:[%s730_s2 + $0x8] sm:$0xff] (!%p159_p3)  ;;  %vm309_vm2 = vcmask (!%p159_p3), 220160  }
   0x8   : > { %580 = vset.pattern.permute.xlu1 (!%p159_p3), %v615_v0  ;;  %579 = vset.pattern.permute.xlu0 (!%p159_p3), %v615_v0  ;;  %v325_v7 = vsel (!%p159_p3), %vm323_vm1, %v324_v2, 0  ;;  %v228_v14 = vld [vmem:[%s730_s2 + $0x28] sm:$0xff] (!%p159_p3)  ;;  %v227_v15 = vld [vmem:[%s730_s2 + $0x20] sm:$0xff] (!%p159_p3)  ;;  %v588_v17 = vld [vmem:[%s729_s1 + $0x10] sm:$0xff] (!%p159_p3)  }
   0x9   : > { %243 = vperm.xlu1 (!%p159_p3), %580, %v225_v3   ;;  %233 = vperm.xlu0 (!%p159_p3), %579, %v223_v4   ;;  %v587_v16 = vld [vmem:[%s729_s1] sm:$0xff] (!%p159_p3)   ;;  %v230_v18 = vld [vmem:[%s730_s2 + $0x38] sm:$0xff] (!%p159_p3)  ;;  %v229_v19 = vld [vmem:[%s730_s2 + $0x30] sm:$0xff] (!%p159_p3) }
   0xa   : > { %v589_v20 = vld [vmem:[%s729_s1 + $0x8] sm:$0xff] (!%p159_p3)   ;;  %v590_v21 = vld [vmem:[%s729_s1 + $0x18] sm:$0xff] (!%p159_p3)  }
   0xd   : > { %248 = vperm.xlu1 (!%p159_p3), %580, %v226_v10   ;;  %238 = vperm.xlu0 (!%p159_p3), %579, %v224_v11  }
   0xe   : > { %s737_s12 = smov (!%p191_p4, %s605_s12), 1 }
   0xf   : > { %s547_s16 = sshll.u32 %s737_s12, 5  ;;  %s548_s21 = sshll.u32 %s737_s12, 7 }
  0x10   : > { %s198_s19 = scalar_lea.vmem %s728_s0, %s547_s16  ;;  %s701_s24 = scalar_lea.vmem %s731_s3, %s548_s21 }
  0x11   : > { %v581_v5 = vld [vmem:[%s198_s19 + $0x4] ss:$8 sps:$4 sm:$0xff]   ;;  %v583_v6 = vld [vmem:[%s198_s19] ss:$8 sps:$4 sm:$0xff]   ;;  %258 = vperm.xlu1 %580, %v228_v14   ;;  %253 = vperm.xlu0 %579, %v227_v15  }
  0x12   : > { %332 = vmatprep.subr.bf16.mxu0 %v581_v5  ;;  %549 = vmatprep.subr.bf16.mxu1 %v581_v5  ;;  %v584_v8 = vld [vmem:[%s198_s19 + $0x14] ss:$8 sps:$4 sm:$0x3f]   ;;  %v586_v9 = vld [vmem:[%s198_s19 + $0x10] ss:$8 sps:$4 sm:$0x3f]  }
  0x13   : > { %333 = vmatpush1.bf16.msra.mxu0 %v583_v6  ;;  %551 = vmatpush1.bf16.msra.mxu1 %v583_v6  ;;  %v330_v12 = vand.u32 %v584_v8, %v325_v7  ;;  %v327_v13 = vand.u32 %v586_v9, %v325_v7 }
  0x15   : > { %334 = vmatprep.subr.bf16.mxu0 %v330_v12  ;;  %550 = vmatprep.subr.bf16.mxu1 %v330_v12 }
  0x16   : > { %268 = vperm.xlu1 %580, %v230_v18   ;;  %263 = vperm.xlu0 %579, %v229_v19  }
  0x17   : > { %335 = vmatpush1.bf16.msra.mxu0 %v327_v13  ;;  %552 = vmatpush1.bf16.msra.mxu1 %v327_v13 }
  0x1a   : > { %541 = vmatmul.mubr.msk.bf16.vlgmr.msra.gmra.mrb[0].mxu0 %vm309_vm2, %v587_v16  ;;  %543 = vmatmul.mubr.msk.bf16.vlgmr.msra.gmra.mrb[0].mxu1 %vm309_vm2, %v588_v17 }
  0x1b   : > { %374 = vmatprep.mubr.bf16.mxu0 %v615_v0  ;;  %394 = vmatprep.mubr.bf16.mxu1 %v615_v0 }
  0x22   : > { %542 = vmatmul.mubr.msk.bf16.gmra.mrb[4].mxu0 %vm309_vm2, %v589_v20  ;;  %544 = vmatmul.mubr.msk.bf16.gmra.mrb[4].mxu1 %vm309_vm2, %v590_v21 }
  0x88   : > { %v244_v22 = vpop.permute.xlu1 %243  ;;  %v234_v23 = vpop.permute.xlu0 %233 }
  0x8c   : > { %v249_v24 = vpop.permute.xlu1 %248  ;;  %v239_v25 = vpop.permute.xlu0 %238 }
  0x90   : > { %v259_v26 = vpop.permute.xlu1 %258  ;;  %v254_v27 = vpop.permute.xlu0 %253 }
  0x95   : > { %v269_v52 = vpop.permute.xlu1 %268  ;;  %v264_v53 = vpop.permute.xlu0 %263 }
  0xed   : > { %v366_v28 = vpop.f32.mrb[0].mxu0  ;;  %v386_v29 = vpop.f32.mrb[0].mxu1 }
  0xee   : > { %v367_v30 = vadd.f32 %v366_v28, %v234_v23  ;;  %v387_v31 = vadd.f32 %v386_v29, %v254_v27  ;;  %v368_v32 = vpop.f32.mrb[1].mxu0  ;;  %v388_v33 = vpop.f32.mrb[1].mxu1 }
  0xef   : > { %v369_v34 = vadd.f32 %v368_v32, %v234_v23  ;;  %v389_v35 = vadd.f32 %v388_v33, %v254_v27  ;;  %v370_v36 = vpop.f32.mrb[2].mxu0  ;;  %v390_v37 = vpop.f32.mrb[2].mxu1 }
  0xf0   : > { %v405_v38 = vmax.f32 %v367_v30, 0.0  ;;  %v413_v39 = vmax.f32 %v387_v31, 0.0  ;;  %v371_v40 = vadd.f32 %v370_v36, %v239_v25  ;;  %v391_v41 = vadd.f32 %v390_v37, %v259_v26  ;;  %v372_v42 = vpop.f32.mrb[3].mxu0  ;;  %v392_v43 = vpop.f32.mrb[3].mxu1 }
  0xf1   : > { %v406_v44 = vmax.f32 %v369_v34, 0.0  ;;  %v414_v45 = vmax.f32 %v389_v35, 0.0  ;;  %v373_v46 = vadd.f32 %v372_v42, %v239_v25  ;;  %v393_v47 = vadd.f32 %v392_v43, %v259_v26 }
  0xf2   : > { %421 = vst [vmem:[%s701_s24] sm:$0xff] %v405_v38  ;;  %429 = vst [vmem:[%s701_s24 + $0x40] sm:$0xff] %v413_v39  ;;  %v407_v48 = vmax.f32 %v371_v40, 0.0  ;;  %v415_v49 = vmax.f32 %v391_v41, 0.0 }
  0xf3   : > { %422 = vst [vmem:[%s701_s24 + $0x8] sm:$0xff] %v406_v44  ;;  %430 = vst [vmem:[%s701_s24 + $0x48] sm:$0xff] %v414_v45  ;;  %v408_v50 = vmax.f32 %v373_v46, 0.0  ;;  %v416_v51 = vmax.f32 %v393_v47, 0.0 }
  0xf4   : > { %423 = vst [vmem:[%s701_s24 + $0x10] sm:$0xff] %v407_v48  ;;  %431 = vst [vmem:[%s701_s24 + $0x50] sm:$0xff] %v415_v49 }
  0xf5   : > { %424 = vst [vmem:[%s701_s24 + $0x18] sm:$0xff] %v408_v50  ;;  %432 = vst [vmem:[%s701_s24 + $0x58] sm:$0xff] %v416_v51  ;;  %v376_v54 = vpop.f32.mrb[4].mxu0  ;;  %v396_v55 = vpop.f32.mrb[4].mxu1 }
  0xf6   : > { %v377_v56 = vadd.f32 %v376_v54, %v244_v22  ;;  %v397_v57 = vadd.f32 %v396_v55, %v264_v53  ;;  %v378_v58 = vpop.f32.mrb[5].mxu0  ;;  %v398_v59 = vpop.f32.mrb[5].mxu1 }
  0xf7   : > { %v379_v60 = vadd.f32 %v378_v58, %v244_v22  ;;  %v399_v61 = vadd.f32 %v398_v59, %v264_v53  ;;  %v380_v62 = vpop.f32.mrb[6].mxu0  ;;  %v400_v63 = vpop.f32.mrb[6].mxu1 }
  0xf8   : > { %v409_v0 = vmax.f32 %v377_v56, 0.0  ;;  %v417_v1 = vmax.f32 %v397_v57, 0.0  ;;  %v381_v2 = vadd.f32 %v380_v62, %v249_v24  ;;  %v401_v3 = vadd.f32 %v400_v63, %v269_v52  ;;  %v382_v4 = vpop.f32.mrb[7].mxu0  ;;  %v402_v5 = vpop.f32.mrb[7].mxu1 }
  0xf9   : > { %v410_v6 = vmax.f32 %v379_v60, 0.0  ;;  %v418_v7 = vmax.f32 %v399_v61, 0.0  ;;  %v383_v8 = vadd.f32 %v382_v4, %v249_v24  ;;  %v403_v9 = vadd.f32 %v402_v5, %v269_v52 }
  0xfa   : > { %425 = vst [vmem:[%s701_s24 + $0x20] sm:$0xff] %v409_v0  ;;  %433 = vst [vmem:[%s701_s24 + $0x60] sm:$0xff] %v417_v1  ;;  %v411_v10 = vmax.f32 %v381_v2, 0.0  ;;  %v419_v11 = vmax.f32 %v401_v3, 0.0 }
  0xfb   : > { %426 = vst [vmem:[%s701_s24 + $0x28] sm:$0xff] %v410_v6  ;;  %434 = vst [vmem:[%s701_s24 + $0x68] sm:$0xff] %v418_v7  ;;  %v412_v12 = vmax.f32 %v383_v8, 0.0  ;;  %v420_v13 = vmax.f32 %v403_v9, 0.0 }
  0xfc   : > { %427 = vst [vmem:[%s701_s24 + $0x30] sm:$0xff] %v411_v10  ;;  %435 = vst [vmem:[%s701_s24 + $0x70] sm:$0xff] %v419_v11 }
  0xfd   : > { %428 = vst [vmem:[%s701_s24 + $0x38] sm:$0xff] %v412_v12  ;;  %436 = vst [vmem:[%s701_s24 + $0x78] sm:$0xff] %v420_v13 }
  0xfe PF: > { %s13_s14 = sadd.s32 1, %s613_s14   ;;  %s732_s12 = smov %s609_s13 }
  0xff   : > { %p10_p5 = scmp.ge.s32.totalorder %s13_s14, 4   ;;  %s733_s13 = smov %s735_s15 }
 0x101   :  { %12 = sbr.rel (!%p10_p5) target bundleno = 2 (0x2), region = 62 }

</bundles_post_ra>
